<compile_context>
chip_gen: v5e
topology: v5e:2x2
jax: 0.10.0
libtpu: 0.0.40
codegen_flags: <defaults>
</compile_context>

<pallas_src>
import jax
import jax.numpy as jnp
from jax.experimental import pallas as pl
from jax.experimental.pallas import tpu as pltpu


def _round_up(x: int, m: int) -> int:
    return ((x + m - 1) // m) * m


def _pick_tile(dim: int, align: int, cap: int):
    """Largest tile (multiple of `align`, <= cap) minimising padding of `dim`.

    Returns (tile, padded_dim)."""
    d = _round_up(dim, align)
    cap = min(_round_up(cap, align), d)
    best_t, best_p = align, d          # t == align always pads d to exactly d
    t = 2 * align
    while t <= cap:
        p = _round_up(d, t)
        if p < best_p or (p == best_p and t > best_t):
            best_t, best_p = t, p
        t += align
    return best_t, best_p


# ----------------------------------------------------------------------------
# Kernels
# ----------------------------------------------------------------------------

def _linear_single_block_kernel(x_ref, wt_ref, b_ref, o_ref):
    # Whole problem in one VMEM block (fast path for tiny shapes).
    acc = jax.lax.dot_general(
        x_ref[...], wt_ref[...],
        dimension_numbers=(((1,), (0,)), ((), ())),
        preferred_element_type=jnp.float32,
    )
    o_ref[...] = (acc + b_ref[...].astype(jnp.float32)).astype(o_ref.dtype)


def _linear_single_k_kernel(x_ref, wt_ref, b_ref, o_ref):
    # One K step per output tile: no accumulator scratch needed.
    acc = jax.lax.dot_general(
        x_ref[...], wt_ref[...],
        dimension_numbers=(((1,), (0,)), ((), ())),
        preferred_element_type=jnp.float32,
    )
    o_ref[...] = (acc + b_ref[...].astype(jnp.float32)).astype(o_ref.dtype)


def _linear_multi_k_kernel(x_ref, wt_ref, b_ref, o_ref, acc_ref):
    # x_ref: [tm, tk]  wt_ref: [tk, tn]  b_ref: [1, tn]  acc_ref: [tm, tn] f32
    k = pl.program_id(2)

    @pl.when(k == 0)
    def _():
        # Fold the bias into the accumulator init (saves an add in the epilogue).
        acc_ref[...] = jnp.broadcast_to(
            b_ref[...].astype(jnp.float32), acc_ref.shape)

    acc_ref[...] += jax.lax.dot_general(
        x_ref[...], wt_ref[...],
        dimension_numbers=(((1,), (0,)), ((), ())),
        preferred_element_type=jnp.float32,
    )

    @pl.when(k == pl.num_programs(2) - 1)
    def _():
        o_ref[...] = acc_ref[...].astype(o_ref.dtype)


# ----------------------------------------------------------------------------
# Wrapper with one-time parameter preparation
# ----------------------------------------------------------------------------

_FAST_PATH_BYTES = 2 * 1024 * 1024   # whole-problem-in-one-block threshold
_VMEM_LIMIT_BYTES = 32 * 1024 * 1024


class MultilabClassPallas:
    """Pallas TPU forward for MultilabClass (a single nn.Linear).

    weight: [n_cond_in, n_inputs]  (PyTorch convention),  bias: [n_cond_in]
    __call__(x): x [B, n_inputs] -> [B, n_cond_in]
    """

    def __init__(self, weight, bias, *, tm_max=512, tn_max=512, tk_max=1024,
                 use_bf16_mxu=False):
        N, K = weight.shape
        self.N, self.K = N, K
        self.tm_max = tm_max
        self.use_bf16 = use_bf16_mxu

        mxu_dtype = jnp.bfloat16 if use_bf16_mxu else weight.dtype

        # --- One-time layout work (hoisted out of the per-call path) ---------
        # W^T -> [K, N] so N lands on the lane axis for both matmul feed and store.
        wt = weight.T.astype(mxu_dtype)
        b2 = bias.reshape(1, N)

        self.tn, self.Np = _pick_tile(N, 128, tn_max)
        self.tk, self.Kp = _pick_tile(K, 128, tk_max)

        if (self.Kp, self.Np) != (K, N):
            self.wt_p = jnp.pad(wt, ((0, self.Kp - K), (0, self.Np - N)))
        else:
            self.wt_p = wt
        if self.Np != N:
            self.b_p = jnp.pad(b2, ((0, 0), (0, self.Np - N)))
        else:
            self.b_p = b2

        # Unpadded copies for the single-block fast path (tiny shapes only).
        self.wt = wt
        self.b2 = b2

    def __call__(self, x):
        B, K = x.shape
        assert K == self.K, f"expected n_inputs={self.K}, got {K}"
        N = self.N
        out_dtype = x.dtype

        x_in = x.astype(self.wt.dtype) if self.use_bf16 else x

        # ---- Fast path: whole problem fits in a single VMEM block -----------
        fast_bytes = 4 * (B * K + K * N + N + B * N)
        if fast_bytes <= _FAST_PATH_BYTES and B <= 1024:
            return pl.pallas_call(
                _linear_single_block_kernel,
                out_shape=jax.ShapeDtypeStruct((B, N), out_dtype),
            )(x_in, self.wt, self.b2)

        # ---- Tiled path ------------------------------------------------------
        Kp, Np, tn, tk = self.Kp, self.Np, self.tn, self.tk
        tm, Mp = _pick_tile(B, 8, self.tm_max)

        # Give v7x's two TensorCores >=2 parallel tiles when the problem is big
        # enough but would otherwise collapse to a (1, 1[, k]) grid.
        if (Mp // tm) * (Np // tn) == 1 and tm % 16 == 0:
            tm //= 2

        if (Mp, Kp) != (B, K):
            x_in = jnp.pad(x_in, ((0, Mp - B), (0, Kp - K)))

        grid_m, grid_n, grid_k = Mp // tm, Np // tn, Kp // tk
        out_shape = jax.ShapeDtypeStruct((Mp, Np), out_dtype)

        if grid_k == 1:
            # Single K step: no accumulator scratch, 2-D parallel grid.
            out_p = pl.pallas_call(
                _linear_single_k_kernel,
                out_shape=out_shape,
                grid=(grid_m, grid_n),
                in_specs=[
                    pl.BlockSpec((tm, Kp), lambda i, j: (i, 0)),   # x tile
                    pl.BlockSpec((Kp, tn), lambda i, j: (0, j)),   # W^T tile
                    pl.BlockSpec((1, tn), lambda i, j: (0, j)),    # bias tile
                ],
                out_specs=pl.BlockSpec((tm, tn), lambda i, j: (i, j)),
                compiler_params=pltpu.CompilerParams(
                    dimension_semantics=("parallel", "parallel"),
                    vmem_limit_bytes=_VMEM_LIMIT_BYTES,
                ),
            )(x_in, self.wt_p, self.b_p)
        else:
            out_p = pl.pallas_call(
                _linear_multi_k_kernel,
                out_shape=out_shape,
                grid=(grid_m, grid_n, grid_k),
                in_specs=[
                    pl.BlockSpec((tm, tk), lambda i, j, k: (i, k)),   # x tile
                    pl.BlockSpec((tk, tn), lambda i, j, k: (k, j)),   # W^T tile
                    pl.BlockSpec((1, tn), lambda i, j, k: (0, j)),    # bias tile
                ],
                out_specs=pl.BlockSpec((tm, tn), lambda i, j, k: (i, j)),
                scratch_shapes=[pltpu.VMEM((tm, tn), jnp.float32)],
                compiler_params=pltpu.CompilerParams(
                    dimension_semantics=("parallel", "parallel", "arbitrary"),
                    vmem_limit_bytes=_VMEM_LIMIT_BYTES,
                ),
            )(x_in, self.wt_p, self.b_p)

        if (Mp, Np) != (B, N):
            out_p = out_p[:B, :N]
        return out_p


def multilab_class_forward(x, weight, bias, **kwargs):
    """Functional convenience wrapper (re-prepares params each call; prefer the
    class for repeated inference so weight transpose/pad is done once)."""
    return MultilabClassPallas(weight, bias, **kwargs)(x)


if __name__ == "__main__":
    # Shapes consistent with the module: n_inputs=32, n_cond_in=8, batch=8.
    B, n_inputs, n_cond_in = 8, 32, 8

    key = jax.random.PRNGKey(0)
    kx, kw, kb = jax.random.split(key, 3)

    x = jax.random.normal(kx, (B, n_inputs), dtype=jnp.float32)
    bound = 1.0 / (n_inputs ** 0.5)   # PyTorch default Linear init range
    weight = jax.random.uniform(kw, (n_cond_in, n_inputs),
                                minval=-bound, maxval=bound, dtype=jnp.float32)
    bias = jax.random.uniform(kb, (n_cond_in,),
                              minval=-bound, maxval=bound, dtype=jnp.float32)

    # --- 1) Module shapes: exercises the single-block fast path --------------
    model = MultilabClassPallas(weight, bias)
    out = jax.block_until_ready(model(x))
    ref = x @ weight.T + bias
    assert out.shape == (B, n_cond_in)
    assert jnp.allclose(out, ref, atol=1e-5, rtol=1e-5)

    # --- 2) Non-128-aligned shape: tiled path, single K step, zero padding ---
    B2, K2, N2 = 512, 640, 384
    k2x, k2w, k2b = jax.random.split(jax.random.PRNGKey(1), 3)
    x2 = jax.random.normal(k2x, (B2, K2), dtype=jnp.float32)
    w2 = jax.random.normal(k2w, (N2, K2), dtype=jnp.float32) * 0.05
    b2 = jax.random.normal(k2b, (N2,), dtype=jnp.float32)
    model2 = MultilabClassPallas(w2, b2)
    out2 = jax.block_until_ready(model2(x2))
    ref2 = x2 @ w2.T + b2
    assert out2.shape == (B2, N2)
    assert jnp.allclose(out2, ref2, atol=1e-3, rtol=1e-3)

    # --- 3) Large K: multi-K-step path with f32 accumulator + bias-folded init
    B3, K3, N3 = 256, 1536, 256
    k3x, k3w, k3b = jax.random.split(jax.random.PRNGKey(2), 3)
    x3 = jax.random.normal(k3x, (B3, K3), dtype=jnp.float32)
    w3 = jax.random.normal(k3w, (N3, K3), dtype=jnp.float32) * 0.03
    b3 = jax.random.normal(k3b, (N3,), dtype=jnp.float32)
    model3 = MultilabClassPallas(w3, b3)
    out3 = jax.block_until_ready(model3(x3))
    ref3 = x3 @ w3.T + b3
    assert out3.shape == (B3, N3)
    assert jnp.allclose(out3, ref3, atol=1e-3, rtol=1e-3)

    print("KERNEL_OK")
</pallas_src>

<mosaic_0001>
module attributes {stable_mosaic.version = 11 : i64} {
  func.func @_linear_single_block_kernel(%arg0: memref<8x32xf32, #tpu.memory_space<vmem>>, %arg1: memref<32x8xf32, #tpu.memory_space<vmem>>, %arg2: memref<1x8xf32, #tpu.memory_space<vmem>>, %arg3: memref<8x8xf32, #tpu.memory_space<vmem>>) attributes {dimension_semantics = [], scalar_prefetch = 0 : i64, scratch_operands = 0 : i64, tpu.core_type = #tpu.core_type<tc>} {
    %c0 = arith.constant 0 : index
    %c0_0 = arith.constant 0 : index
    %0 = vector.load %arg0[%c0, %c0_0] : memref<8x32xf32, #tpu.memory_space<vmem>>, vector<8x32xf32>
    %c0_1 = arith.constant 0 : index
    %c0_2 = arith.constant 0 : index
    %1 = vector.load %arg1[%c0_1, %c0_2] : memref<32x8xf32, #tpu.memory_space<vmem>>, vector<32x8xf32>
    %cst = arith.constant dense<0.000000e+00> : vector<8x8xf32>
    %2 = tpu.matmul %0, %1, %cst {dimension_numbers = #tpu.dot_dimension_numbers<[1], [0], [0], [1], [0, 0, 1, 1], [], []>} : vector<8x32xf32>, vector<32x8xf32>, vector<8x8xf32> -> vector<8x8xf32>
    %c0_3 = arith.constant 0 : index
    %c0_4 = arith.constant 0 : index
    %3 = vector.load %arg2[%c0_3, %c0_4] : memref<1x8xf32, #tpu.memory_space<vmem>>, vector<1x8xf32>
    %4 = vector.broadcast %3 : vector<1x8xf32> to vector<8x8xf32>
    %5 = arith.addf %2, %4 : vector<8x8xf32>
    %c0_5 = arith.constant 0 : index
    %c0_6 = arith.constant 0 : index
    %6 = vector.load %arg3[%c0_5, %c0_6] : memref<8x8xf32, #tpu.memory_space<vmem>>, vector<8x8xf32>
    tpu.vector_store %arg3[%c0_5, %c0_6], %5 {strides = array<i32>} : memref<8x8xf32, #tpu.memory_space<vmem>>, vector<8x8xf32>,
    return
  }
}

</mosaic_0001>

<bundles_post_ra>
// kernel: tpu_custom_call.1
= control target key start
LH: loop header
LB: loop body
LE: loop exit
PB: predicated region body
PF: predicated region fallthrough
CT: control target
= control target key end

     0   :  { %s137_s0 = inlined_call_operand.vmem [shape: f32[8,32], index: 0, kind: input, shape index: {}]   ;;  %s138_s1 = inlined_call_operand.vmem [shape: f32[32,8], index: 1, kind: input, shape index: {}]   ;;  %s139_s2 = inlined_call_operand.vmem [shape: f32[1,8], index: 2, kind: input, shape index: {}]   ;;  %s140_s3 = inlined_call_operand.hbm [shape: f32[8,8], index: 3, kind: output, shape index: {}]  }
   0x1   :  { %v19_v0 = vld [vmem:[%s138_s1 + $0x18] sm:$0xff]  ;;  %v18_v1 = vld [vmem:[%s138_s1 + $0x10] sm:$0xff]  ;;  %v17_v2 = vld [vmem:[%s138_s1 + $0x8] sm:$0xff] }
   0x2   :  { %40 = vmatpush.msra.mxu0 %v19_v0 }
   0x3   :  { %8 = vsyncpa [#allocation3], 0  ;;  %v16_v3 = vld [vmem:[%s138_s1] sm:$0xff]  ;;  %vm24_vm0 = vcmask 261120   ;;  %s95_s24 = smov [#allocation2]   ;;  %s57_s28 = sshll.u32 %s140_s3, 4  ;;  %s58_s28 = int_to_ptr.hbm [resolvable:$true] %s57_s28 }
   0x4   :  { %41 = vmatpush.msra.mxu0 %v18_v1  ;;  %v15_v4 = vld [vmem:[%s137_s0] sm:$0xff]  ;;  %s55_s25 = sshll.u32 %s95_s24, 4  ;;  %vm48_vm1 = vcmask 64512   ;;  %s56_s25 = int_to_ptr.vmem [resolvable:$true] %s55_s25 }
   0x5   :  { %v68_v5 = vld [vmem:[%s139_s2] ss:$0 sm:$0xff] }
   0x6   :  { %42 = vmatpush.msra.mxu0 %v17_v2 }
   0x8   :  { %43 = vmatpush.msra.mxu0 %v16_v3 }
   0x9   :  { %66 = vmatmul.msk.f32.vlgmr.msra.gmra.mxu0 %vm24_vm0, %v15_v4 }
  0x86   :  { %v45_v6 = vpop.f32.mrf.mxu0 }
  0x87   :  { %v46_v7 = vadd.f32 %v68_v5, %v45_v6 }
  0x89   :  { %49 = vst.msk [vmem:[#allocation2] sm:$0xff] %vm48_vm1, %v46_v7 }
  0x8a   :  { %60 = dma.vmem_to_hbm [thread:$0]  %s56_s25, 128, %s58_s28, [#allocation3]  }
  0x8b   :  { %93 = dma.done.wait [#allocation3], 128  }
  0x8c   :  { %94 = vsyncadd [#allocation3], 4294967168 }
  0x8d   :  { %65 = vsyncpa [#allocation3], 1 }

</bundles_post_ra>
